<compile_context>
chip_gen: v5e
topology: v5e:2x2
jax: 0.10.0
libtpu: 0.0.40
codegen_flags: <defaults>
</compile_context>

<pallas_src>
import functools
import math

import jax
import jax.numpy as jnp
from jax.experimental import pallas as pl
from jax.experimental.pallas import tpu as pltpu


# ----------------------------------------------------------------------------
# Kernel: one (image, row-block) step of the direct 3x3 conv + bias + ReLU.
# ----------------------------------------------------------------------------
def _conv3x3_relu_kernel(x_ref, w_ref, b_ref, ml_ref, mr_ref, o_ref, *, th, W):
    """Computes relu(conv3x3(x) + b) for `th` output rows of one image.

    x_ref : (Cin, L) bf16      flat H-padded pixels covering the block + halo
    w_ref : (9, Cout, Cin) bf16 tap matrices (kh*3 + kw)
    b_ref : (Cout, 1) f32
    ml/mr : (1, th*W) bf16     0/1 masks killing wrapped left/right columns
    o_ref : (Cout, th*W) f32   lane-dense output block (pixels on lanes)
    """
    tpix = th * W
    acc = jnp.zeros(o_ref.shape, jnp.float32)
    for kh in range(3):
        for kw in range(3):
            start = kh * W + kw                       # static, contiguous slice
            a = x_ref[:, start:start + tpix]          # (Cin, tpix) bf16
            if kw == 0:
                a = a * ml_ref[...]                   # zero w==0 (col -1 wrap)
            elif kw == 2:
                a = a * mr_ref[...]                   # zero w==W-1 (col W wrap)
            # (Cout, Cin) x (Cin, tpix) -> (Cout, tpix) f32 on the MXU.
            acc = acc + jnp.dot(w_ref[kh * 3 + kw], a,
                                preferred_element_type=jnp.float32)
    o_ref[...] = jnp.maximum(acc + b_ref[...], 0.0)


# ----------------------------------------------------------------------------
# Block-size / VMEM heuristics.
# ----------------------------------------------------------------------------
def _pick_row_block(H, W, Cin, Cout, budget=8 * 1024 * 1024):
    """Pick th (output rows per grid step). th | H; (th*W) % 128 == 0 unless th == H."""
    def blk_bytes(th):
        tpix = th * W
        L = (th + 2) * W + 2
        return (2 * Cin * L * 2          # double-buffered bf16 input block
                + 2 * Cout * tpix * 4    # double-buffered f32 output block
                + Cout * tpix * 4        # live accumulator
                + 3 * Cin * tpix * 2)    # tap-slice temporaries

    legal = [t for t in range(1, H + 1)
             if H % t == 0 and (t == H or (t * W) % 128 == 0)]
    good = [t for t in legal if t * W <= 4096 and blk_bytes(t) <= budget]
    if good:
        return max(good)
    return min(legal, key=blk_bytes)


def _vmem_limit_bytes(Cin, Cout, th, W):
    tpix = th * W
    L = (th + 2) * W + 2
    rup = lambda v, m: (v + m - 1) // m * m
    est = (2 * rup(Cin, 16) * rup(L, 128) * 2        # x blocks (x2 buffers)
           + 2 * rup(Cout, 8) * rup(tpix, 128) * 4   # out blocks (x2 buffers)
           + rup(Cout, 8) * rup(tpix, 128) * 4       # accumulator
           + 9 * rup(Cout, 16) * rup(Cin, 128) * 2   # weights
           + rup(Cout, 8) * 128 * 4                  # bias
           + 2 * 16 * rup(tpix, 128) * 2             # masks
           + 3 * rup(Cin, 16) * rup(tpix, 128) * 2)  # tap temporaries
    try:
        phys = int(getattr(pltpu.get_tpu_info(), "vmem_capacity_bytes",
                           128 * 1024 * 1024))
    except Exception:
        phys = 128 * 1024 * 1024
    cap = (phys * 3) // 4            # ~48 MiB headroom cap on v7x, ~96 MiB on v5e/v6e
    return int(max(min(2 * est, cap), min(16 * 1024 * 1024, cap)))


# ----------------------------------------------------------------------------
# ConvRelu forward: ReLU(Conv2d(x, w, b, kernel=3, stride=1, padding=1))
# ----------------------------------------------------------------------------
def conv_relu(x, w, b):
    """x: (N, Cin, H, W) NCHW; w: (Cout, Cin, 3, 3); b: (Cout,). Returns NCHW f32."""
    N, Cin, H, W = x.shape
    Cout, Cin2, KH, KW = w.shape
    assert (Cin2, KH, KW) == (Cin, 3, 3) and b.shape == (Cout,)

    th = _pick_row_block(H, W, Cin, Cout)
    nb = H // th
    tpix = th * W
    L = (th + 2) * W + 2            # flat pixels the kernel needs per row block

    # Activations stay NCHW: pad H by (2, 2) zero rows, flatten (H, W) into a
    # single pixel axis (free), cast to bf16 (MXU-native).
    xp = jnp.pad(x.astype(jnp.bfloat16), ((0, 0), (0, 0), (2, 2), (0, 0)))
    xpf = xp.reshape(N, Cin, (H + 4) * W)
    # Row-blocked halo copy: block bb holds exactly the flat window the kernel
    # needs for output rows [bb*th, bb*th + th).
    starts = [(bb * th + 1) * W - 1 for bb in range(nb)]
    xh = jnp.stack([xpf[:, :, s:s + L] for s in starts], axis=1)  # (N, nb, Cin, L)

    # Weights as 9 (Cout, Cin) tap matrices; bias as a (Cout, 1) column.
    wt = jnp.transpose(w, (2, 3, 0, 1)).reshape(9, Cout, Cin).astype(jnp.bfloat16)
    bias = b.reshape(Cout, 1).astype(jnp.float32)

    # 0/1 masks killing the wrapped left / right columns (w-1 < 0, w+1 >= W).
    col = jnp.arange(tpix, dtype=jnp.int32) % W
    mask_l = (col != 0).astype(jnp.bfloat16).reshape(1, tpix)
    mask_r = (col != W - 1).astype(jnp.bfloat16).reshape(1, tpix)

    out = pl.pallas_call(
        functools.partial(_conv3x3_relu_kernel, th=th, W=W),
        out_shape=jax.ShapeDtypeStruct((N, Cout, H * W), jnp.float32),
        grid_spec=pltpu.PrefetchScalarGridSpec(
            num_scalar_prefetch=0,
            grid=(N, nb),
            in_specs=[
                pl.BlockSpec((None, None, Cin, L), lambda n, bb: (n, bb, 0, 0)),
                pl.BlockSpec((9, Cout, Cin), lambda n, bb: (0, 0, 0)),
                pl.BlockSpec((Cout, 1), lambda n, bb: (0, 0)),
                pl.BlockSpec((1, tpix), lambda n, bb: (0, 0)),
                pl.BlockSpec((1, tpix), lambda n, bb: (0, 0)),
            ],
            out_specs=pl.BlockSpec((None, Cout, tpix), lambda n, bb: (n, 0, bb)),
        ),
        compiler_params=pltpu.CompilerParams(
            dimension_semantics=("parallel", "parallel"),
            vmem_limit_bytes=_vmem_limit_bytes(Cin, Cout, th, W),
        ),
    )(xh, wt, bias, mask_l, mask_r)

    # (N, Cout, H*W) is already NCHW-ordered row-major: the reshape is free.
    return out.reshape(N, Cout, H, W)


# ----------------------------------------------------------------------------
if __name__ == "__main__":
    key = jax.random.PRNGKey(0)
    kx, kw_key, kb_key = jax.random.split(key, 3)

    N, Cin, H, W, Cout = 2, 4, 16, 16, 32
    x = jax.random.normal(kx, (N, Cin, H, W), jnp.float32)
    # PyTorch Conv2d default init: U(-1/sqrt(fan_in), 1/sqrt(fan_in))
    bound = 1.0 / math.sqrt(Cin * 3 * 3)
    w = jax.random.uniform(kw_key, (Cout, Cin, 3, 3), jnp.float32, -bound, bound)
    b = jax.random.uniform(kb_key, (Cout,), jnp.float32, -bound, bound)

    fwd = jax.jit(conv_relu)
    out = jax.block_until_ready(fwd(x, w, b))

    assert out.shape == (N, Cout, H, W), out.shape
    assert out.dtype == jnp.float32
    assert bool(jnp.all(jnp.isfinite(out)))
    assert bool(jnp.all(out >= 0.0))           # ReLU output

    # Cross-check against XLA's conv (same bf16 operands, f32 accumulation).
    ref = jax.lax.conv_general_dilated(
        x.astype(jnp.bfloat16), w.astype(jnp.bfloat16),
        window_strides=(1, 1), padding=((1, 1), (1, 1)),
        dimension_numbers=("NCHW", "OIHW", "NCHW"),
        preferred_element_type=jnp.float32)
    ref = jnp.maximum(ref + b[None, :, None, None], 0.0)
    assert bool(jnp.allclose(out, ref, atol=2e-2, rtol=2e-2)), \
        float(jnp.max(jnp.abs(out - ref)))

    print("KERNEL_OK")
</pallas_src>

<mosaic_0001>
module attributes {stable_mosaic.version = 11 : i64} {
  func.func @_conv3x3_relu_kernel(%arg0: i32, %arg1: i32, %arg2: memref<1x1x4x290xbf16, #tpu.memory_space<vmem>>, %arg3: memref<9x32x4xbf16, #tpu.memory_space<vmem>>, %arg4: memref<32x1xf32, #tpu.memory_space<vmem>>, %arg5: memref<1x256xbf16, #tpu.memory_space<vmem>>, %arg6: memref<1x256xbf16, #tpu.memory_space<vmem>>, %arg7: memref<1x32x256xf32, #tpu.memory_space<vmem>>) attributes {dimension_semantics = [#tpu.dimension_semantics<parallel>, #tpu.dimension_semantics<parallel>], iteration_bounds = array<i64: 2, 1>, scalar_prefetch = 0 : i64, scratch_operands = 0 : i64, tpu.core_type = #tpu.core_type<tc>, window_params = [{transform_indices = @transform_0, window_bounds = array<i64: 1, 1, 4, 290>}, {pipeline_mode = #tpu.pipeline_mode<synchronous>, transform_indices = @transform_1, window_bounds = array<i64: 9, 32, 4>}, {pipeline_mode = #tpu.pipeline_mode<synchronous>, transform_indices = @transform_2, window_bounds = array<i64: 32, 1>}, {pipeline_mode = #tpu.pipeline_mode<synchronous>, transform_indices = @transform_3, window_bounds = array<i64: 1, 256>}, {pipeline_mode = #tpu.pipeline_mode<synchronous>, transform_indices = @transform_4, window_bounds = array<i64: 1, 256>}, {transform_indices = @transform_5, window_bounds = array<i64: 1, 32, 256>}]} {
    %cst = arith.constant 0.000000e+00 : f32
    %0 = vector.broadcast %cst : f32 to vector<32x256xf32>
    %c0 = arith.constant 0 : index
    %c0_0 = arith.constant 0 : index
    %c0_1 = arith.constant 0 : index
    %c0_2 = arith.constant 0 : index
    %1 = vector.load %arg2[%c0, %c0_0, %c0_1, %c0_2] : memref<1x1x4x290xbf16, #tpu.memory_space<vmem>>, vector<1x1x4x256xbf16>
    %2 = vector.shape_cast %1 : vector<1x1x4x256xbf16> to vector<4x256xbf16>
    %c0_3 = arith.constant 0 : index
    %c0_4 = arith.constant 0 : index
    %3 = vector.load %arg5[%c0_3, %c0_4] : memref<1x256xbf16, #tpu.memory_space<vmem>>, vector<1x256xbf16>
    %4 = vector.broadcast %3 : vector<1x256xbf16> to vector<4x256xbf16>
    %5 = arith.mulf %2, %4 : vector<4x256xbf16>
    %c0_5 = arith.constant 0 : index
    %c0_6 = arith.constant 0 : index
    %c0_7 = arith.constant 0 : index
    %6 = vector.load %arg3[%c0_5, %c0_6, %c0_7] : memref<9x32x4xbf16, #tpu.memory_space<vmem>>, vector<1x32x4xbf16>
    %7 = vector.shape_cast %6 : vector<1x32x4xbf16> to vector<32x4xbf16>
    %cst_8 = arith.constant dense<0.000000e+00> : vector<32x256xf32>
    %8 = tpu.matmul %7, %5, %cst_8 {dimension_numbers = #tpu.dot_dimension_numbers<[1], [0], [0], [1], [0, 0, 1, 1], [], []>} : vector<32x4xbf16>, vector<4x256xbf16>, vector<32x256xf32> -> vector<32x256xf32>
    %9 = arith.addf %0, %8 : vector<32x256xf32>
    %c0_9 = arith.constant 0 : index
    %c0_10 = arith.constant 0 : index
    %c0_11 = arith.constant 0 : index
    %c1 = arith.constant 1 : index
    %10 = vector.load %arg2[%c0_9, %c0_10, %c0_11, %c1] : memref<1x1x4x290xbf16, #tpu.memory_space<vmem>>, vector<1x1x4x256xbf16>
    %11 = vector.shape_cast %10 : vector<1x1x4x256xbf16> to vector<4x256xbf16>
    %c1_12 = arith.constant 1 : index
    %c0_13 = arith.constant 0 : index
    %c0_14 = arith.constant 0 : index
    %12 = vector.load %arg3[%c1_12, %c0_13, %c0_14] : memref<9x32x4xbf16, #tpu.memory_space<vmem>>, vector<1x32x4xbf16>
    %13 = vector.shape_cast %12 : vector<1x32x4xbf16> to vector<32x4xbf16>
    %cst_15 = arith.constant dense<0.000000e+00> : vector<32x256xf32>
    %14 = tpu.matmul %13, %11, %cst_15 {dimension_numbers = #tpu.dot_dimension_numbers<[1], [0], [0], [1], [0, 0, 1, 1], [], []>} : vector<32x4xbf16>, vector<4x256xbf16>, vector<32x256xf32> -> vector<32x256xf32>
    %15 = arith.addf %9, %14 : vector<32x256xf32>
    %c0_16 = arith.constant 0 : index
    %c0_17 = arith.constant 0 : index
    %c0_18 = arith.constant 0 : index
    %c2 = arith.constant 2 : index
    %16 = vector.load %arg2[%c0_16, %c0_17, %c0_18, %c2] : memref<1x1x4x290xbf16, #tpu.memory_space<vmem>>, vector<1x1x4x256xbf16>
    %17 = vector.shape_cast %16 : vector<1x1x4x256xbf16> to vector<4x256xbf16>
    %c0_19 = arith.constant 0 : index
    %c0_20 = arith.constant 0 : index
    %18 = vector.load %arg6[%c0_19, %c0_20] : memref<1x256xbf16, #tpu.memory_space<vmem>>, vector<1x256xbf16>
    %19 = vector.broadcast %18 : vector<1x256xbf16> to vector<4x256xbf16>
    %20 = arith.mulf %17, %19 : vector<4x256xbf16>
    %c2_21 = arith.constant 2 : index
    %c0_22 = arith.constant 0 : index
    %c0_23 = arith.constant 0 : index
    %21 = vector.load %arg3[%c2_21, %c0_22, %c0_23] : memref<9x32x4xbf16, #tpu.memory_space<vmem>>, vector<1x32x4xbf16>
    %22 = vector.shape_cast %21 : vector<1x32x4xbf16> to vector<32x4xbf16>
    %cst_24 = arith.constant dense<0.000000e+00> : vector<32x256xf32>
    %23 = tpu.matmul %22, %20, %cst_24 {dimension_numbers = #tpu.dot_dimension_numbers<[1], [0], [0], [1], [0, 0, 1, 1], [], []>} : vector<32x4xbf16>, vector<4x256xbf16>, vector<32x256xf32> -> vector<32x256xf32>
    %24 = arith.addf %15, %23 : vector<32x256xf32>
    %c0_25 = arith.constant 0 : index
    %c0_26 = arith.constant 0 : index
    %c0_27 = arith.constant 0 : index
    %c16 = arith.constant 16 : index
    %25 = vector.load %arg2[%c0_25, %c0_26, %c0_27, %c16] : memref<1x1x4x290xbf16, #tpu.memory_space<vmem>>, vector<1x1x4x256xbf16>
    %26 = vector.shape_cast %25 : vector<1x1x4x256xbf16> to vector<4x256xbf16>
    %c0_28 = arith.constant 0 : index
    %c0_29 = arith.constant 0 : index
    %27 = vector.load %arg5[%c0_28, %c0_29] : memref<1x256xbf16, #tpu.memory_space<vmem>>, vector<1x256xbf16>
    %28 = vector.broadcast %27 : vector<1x256xbf16> to vector<4x256xbf16>
    %29 = arith.mulf %26, %28 : vector<4x256xbf16>
    %c3 = arith.constant 3 : index
    %c0_30 = arith.constant 0 : index
    %c0_31 = arith.constant 0 : index
    %30 = vector.load %arg3[%c3, %c0_30, %c0_31] : memref<9x32x4xbf16, #tpu.memory_space<vmem>>, vector<1x32x4xbf16>
    %31 = vector.shape_cast %30 : vector<1x32x4xbf16> to vector<32x4xbf16>
    %cst_32 = arith.constant dense<0.000000e+00> : vector<32x256xf32>
    %32 = tpu.matmul %31, %29, %cst_32 {dimension_numbers = #tpu.dot_dimension_numbers<[1], [0], [0], [1], [0, 0, 1, 1], [], []>} : vector<32x4xbf16>, vector<4x256xbf16>, vector<32x256xf32> -> vector<32x256xf32>
    %33 = arith.addf %24, %32 : vector<32x256xf32>
    %c0_33 = arith.constant 0 : index
    %c0_34 = arith.constant 0 : index
    %c0_35 = arith.constant 0 : index
    %c17 = arith.constant 17 : index
    %34 = vector.load %arg2[%c0_33, %c0_34, %c0_35, %c17] : memref<1x1x4x290xbf16, #tpu.memory_space<vmem>>, vector<1x1x4x256xbf16>
    %35 = vector.shape_cast %34 : vector<1x1x4x256xbf16> to vector<4x256xbf16>
    %c4 = arith.constant 4 : index
    %c0_36 = arith.constant 0 : index
    %c0_37 = arith.constant 0 : index
    %36 = vector.load %arg3[%c4, %c0_36, %c0_37] : memref<9x32x4xbf16, #tpu.memory_space<vmem>>, vector<1x32x4xbf16>
    %37 = vector.shape_cast %36 : vector<1x32x4xbf16> to vector<32x4xbf16>
    %cst_38 = arith.constant dense<0.000000e+00> : vector<32x256xf32>
    %38 = tpu.matmul %37, %35, %cst_38 {dimension_numbers = #tpu.dot_dimension_numbers<[1], [0], [0], [1], [0, 0, 1, 1], [], []>} : vector<32x4xbf16>, vector<4x256xbf16>, vector<32x256xf32> -> vector<32x256xf32>
    %39 = arith.addf %33, %38 : vector<32x256xf32>
    %c0_39 = arith.constant 0 : index
    %c0_40 = arith.constant 0 : index
    %c0_41 = arith.constant 0 : index
    %c18 = arith.constant 18 : index
    %40 = vector.load %arg2[%c0_39, %c0_40, %c0_41, %c18] : memref<1x1x4x290xbf16, #tpu.memory_space<vmem>>, vector<1x1x4x256xbf16>
    %41 = vector.shape_cast %40 : vector<1x1x4x256xbf16> to vector<4x256xbf16>
    %c0_42 = arith.constant 0 : index
    %c0_43 = arith.constant 0 : index
    %42 = vector.load %arg6[%c0_42, %c0_43] : memref<1x256xbf16, #tpu.memory_space<vmem>>, vector<1x256xbf16>
    %43 = vector.broadcast %42 : vector<1x256xbf16> to vector<4x256xbf16>
    %44 = arith.mulf %41, %43 : vector<4x256xbf16>
    %c5 = arith.constant 5 : index
    %c0_44 = arith.constant 0 : index
    %c0_45 = arith.constant 0 : index
    %45 = vector.load %arg3[%c5, %c0_44, %c0_45] : memref<9x32x4xbf16, #tpu.memory_space<vmem>>, vector<1x32x4xbf16>
    %46 = vector.shape_cast %45 : vector<1x32x4xbf16> to vector<32x4xbf16>
    %cst_46 = arith.constant dense<0.000000e+00> : vector<32x256xf32>
    %47 = tpu.matmul %46, %44, %cst_46 {dimension_numbers = #tpu.dot_dimension_numbers<[1], [0], [0], [1], [0, 0, 1, 1], [], []>} : vector<32x4xbf16>, vector<4x256xbf16>, vector<32x256xf32> -> vector<32x256xf32>
    %48 = arith.addf %39, %47 : vector<32x256xf32>
    %c0_47 = arith.constant 0 : index
    %c0_48 = arith.constant 0 : index
    %c0_49 = arith.constant 0 : index
    %c32 = arith.constant 32 : index
    %49 = vector.load %arg2[%c0_47, %c0_48, %c0_49, %c32] : memref<1x1x4x290xbf16, #tpu.memory_space<vmem>>, vector<1x1x4x256xbf16>
    %50 = vector.shape_cast %49 : vector<1x1x4x256xbf16> to vector<4x256xbf16>
    %c0_50 = arith.constant 0 : index
    %c0_51 = arith.constant 0 : index
    %51 = vector.load %arg5[%c0_50, %c0_51] : memref<1x256xbf16, #tpu.memory_space<vmem>>, vector<1x256xbf16>
    %52 = vector.broadcast %51 : vector<1x256xbf16> to vector<4x256xbf16>
    %53 = arith.mulf %50, %52 : vector<4x256xbf16>
    %c6 = arith.constant 6 : index
    %c0_52 = arith.constant 0 : index
    %c0_53 = arith.constant 0 : index
    %54 = vector.load %arg3[%c6, %c0_52, %c0_53] : memref<9x32x4xbf16, #tpu.memory_space<vmem>>, vector<1x32x4xbf16>
    %55 = vector.shape_cast %54 : vector<1x32x4xbf16> to vector<32x4xbf16>
    %cst_54 = arith.constant dense<0.000000e+00> : vector<32x256xf32>
    %56 = tpu.matmul %55, %53, %cst_54 {dimension_numbers = #tpu.dot_dimension_numbers<[1], [0], [0], [1], [0, 0, 1, 1], [], []>} : vector<32x4xbf16>, vector<4x256xbf16>, vector<32x256xf32> -> vector<32x256xf32>
    %57 = arith.addf %48, %56 : vector<32x256xf32>
    %c0_55 = arith.constant 0 : index
    %c0_56 = arith.constant 0 : index
    %c0_57 = arith.constant 0 : index
    %c33 = arith.constant 33 : index
    %58 = vector.load %arg2[%c0_55, %c0_56, %c0_57, %c33] : memref<1x1x4x290xbf16, #tpu.memory_space<vmem>>, vector<1x1x4x256xbf16>
    %59 = vector.shape_cast %58 : vector<1x1x4x256xbf16> to vector<4x256xbf16>
    %c7 = arith.constant 7 : index
    %c0_58 = arith.constant 0 : index
    %c0_59 = arith.constant 0 : index
    %60 = vector.load %arg3[%c7, %c0_58, %c0_59] : memref<9x32x4xbf16, #tpu.memory_space<vmem>>, vector<1x32x4xbf16>
    %61 = vector.shape_cast %60 : vector<1x32x4xbf16> to vector<32x4xbf16>
    %cst_60 = arith.constant dense<0.000000e+00> : vector<32x256xf32>
    %62 = tpu.matmul %61, %59, %cst_60 {dimension_numbers = #tpu.dot_dimension_numbers<[1], [0], [0], [1], [0, 0, 1, 1], [], []>} : vector<32x4xbf16>, vector<4x256xbf16>, vector<32x256xf32> -> vector<32x256xf32>
    %63 = arith.addf %57, %62 : vector<32x256xf32>
    %c0_61 = arith.constant 0 : index
    %c0_62 = arith.constant 0 : index
    %c0_63 = arith.constant 0 : index
    %c34 = arith.constant 34 : index
    %64 = vector.load %arg2[%c0_61, %c0_62, %c0_63, %c34] : memref<1x1x4x290xbf16, #tpu.memory_space<vmem>>, vector<1x1x4x256xbf16>
    %65 = vector.shape_cast %64 : vector<1x1x4x256xbf16> to vector<4x256xbf16>
    %c0_64 = arith.constant 0 : index
    %c0_65 = arith.constant 0 : index
    %66 = vector.load %arg6[%c0_64, %c0_65] : memref<1x256xbf16, #tpu.memory_space<vmem>>, vector<1x256xbf16>
    %67 = vector.broadcast %66 : vector<1x256xbf16> to vector<4x256xbf16>
    %68 = arith.mulf %65, %67 : vector<4x256xbf16>
    %c8 = arith.constant 8 : index
    %c0_66 = arith.constant 0 : index
    %c0_67 = arith.constant 0 : index
    %69 = vector.load %arg3[%c8, %c0_66, %c0_67] : memref<9x32x4xbf16, #tpu.memory_space<vmem>>, vector<1x32x4xbf16>
    %70 = vector.shape_cast %69 : vector<1x32x4xbf16> to vector<32x4xbf16>
    %cst_68 = arith.constant dense<0.000000e+00> : vector<32x256xf32>
    %71 = tpu.matmul %70, %68, %cst_68 {dimension_numbers = #tpu.dot_dimension_numbers<[1], [0], [0], [1], [0, 0, 1, 1], [], []>} : vector<32x4xbf16>, vector<4x256xbf16>, vector<32x256xf32> -> vector<32x256xf32>
    %72 = arith.addf %63, %71 : vector<32x256xf32>
    %c0_69 = arith.constant 0 : index
    %c0_70 = arith.constant 0 : index
    %73 = vector.load %arg4[%c0_69, %c0_70] : memref<32x1xf32, #tpu.memory_space<vmem>>, vector<32x1xf32>
    %74 = vector.broadcast %73 : vector<32x1xf32> to vector<32x256xf32>
    %75 = arith.addf %72, %74 : vector<32x256xf32>
    %cst_71 = arith.constant 0.000000e+00 : f32
    %76 = vector.broadcast %cst_71 : f32 to vector<32x256xf32>
    %77 = arith.maximumf %75, %76 : vector<32x256xf32>
    %c0_72 = arith.constant 0 : index
    %c0_73 = arith.constant 0 : index
    %c0_74 = arith.constant 0 : index
    %78 = vector.load %arg7[%c0_72, %c0_73, %c0_74] : memref<1x32x256xf32, #tpu.memory_space<vmem>>, vector<1x32x256xf32>
    %79 = vector.shape_cast %78 : vector<1x32x256xf32> to vector<32x256xf32>
    %80 = vector.shape_cast %77 : vector<32x256xf32> to vector<1x32x256xf32>
    tpu.vector_store %arg7[%c0_72, %c0_73, %c0_74], %80 {strides = array<i32>} : memref<1x32x256xf32, #tpu.memory_space<vmem>>, vector<1x32x256xf32>,
    return
  }
  func.func @transform_0(%arg0: i32, %arg1: i32) -> (i32, i32, i32, i32) {
    %c0_i32 = arith.constant 0 : i32
    %c0_i32_0 = arith.constant 0 : i32
    %c0_i32_1 = arith.constant 0 : i32
    return %arg0, %arg1, %c0_i32, %c0_i32_0 : i32, i32, i32, i32
  }
  func.func @transform_1(%arg0: i32, %arg1: i32) -> (i32, i32, i32) {
    %c0_i32 = arith.constant 0 : i32
    %c0_i32_0 = arith.constant 0 : i32
    %c0_i32_1 = arith.constant 0 : i32
    %c0_i32_2 = arith.constant 0 : i32
    return %c0_i32, %c0_i32_0, %c0_i32_1 : i32, i32, i32
  }
  func.func @transform_2(%arg0: i32, %arg1: i32) -> (i32, i32) {
    %c0_i32 = arith.constant 0 : i32
    %c0_i32_0 = arith.constant 0 : i32
    %c0_i32_1 = arith.constant 0 : i32
    return %c0_i32, %c0_i32_0 : i32, i32
  }
  func.func @transform_3(%arg0: i32, %arg1: i32) -> (i32, i32) {
    %c0_i32 = arith.constant 0 : i32
    %c0_i32_0 = arith.constant 0 : i32
    %c0_i32_1 = arith.constant 0 : i32
    return %c0_i32, %c0_i32_0 : i32, i32
  }
  func.func @transform_4(%arg0: i32, %arg1: i32) -> (i32, i32) {
    %c0_i32 = arith.constant 0 : i32
    %c0_i32_0 = arith.constant 0 : i32
    %c0_i32_1 = arith.constant 0 : i32
    return %c0_i32, %c0_i32_0 : i32, i32
  }
  func.func @transform_5(%arg0: i32, %arg1: i32) -> (i32, i32, i32) {
    %c0_i32 = arith.constant 0 : i32
    %c0_i32_0 = arith.constant 0 : i32
    return %arg0, %c0_i32, %arg1 : i32, i32, i32
  }
}

</mosaic_0001>

<bundles_post_ra>
// kernel: conv_relu.1
= control target key start
LH: loop header
LB: loop body
LE: loop exit
PB: predicated region body
PF: predicated region fallthrough
CT: control target
= control target key end

     0   :  { %s1615_s18 = smov 0   ;;  %s1617_s19 = smov 0   ;;  %s1866_s0 = inlined_call_operand.vmem [shape: bf16[2,1,4,290], index: 0, kind: input, shape index: {}]   ;;  %s1867_s1 = inlined_call_operand.vmem [shape: bf16[9,32,4], index: 1, kind: input, shape index: {}]   ;;  %s1868_s2 = inlined_call_operand.vmem [shape: f32[32,1], index: 2, kind: input, shape index: {}]   ;;  %s1869_s3 = inlined_call_operand.vmem [shape: bf16[1,256], index: 3, kind: input, shape index: {}]   ;;  %s1870_s4 = inlined_call_operand.vmem [shape: bf16[1,256], index: 4, kind: input, shape index: {}]   ;;  %s1871_s5 = inlined_call_operand.vmem [shape: f32[2,32,256], index: 5, kind: output, shape index: {}]  }
   0x1   :  { %s1619_s20 = smov 0  }
   0x2 LB: > { %s27_s21 = sadd.s32 1, %s1565_s19  ;;  %p1338_p0 = scmp.ge.s32.totalorder %s1569_s20, 1  ;;  %s1569_s20 = sphi %s1619_s20, %s15_s20   ;;  %s1565_s19 = sphi %s1617_s19, %s1873_s19   ;;  %s1561_s18 = sphi %s1615_s18, %s1872_s18  }
   0x3   : > { %p29_p1 = scmp.ge.s32.totalorder %s27_s21, 2  ;;  %p207_p2 = scmp.lt.s32.totalorder %s1569_s20, 3 }
   0x5   : > { %s1875_s21 = smov (%p29_p1, %s27_s21), 0  ;;  %p208_p3 = pnand %p1338_p0, %p207_p2 }
   0x6   : > { %p243_p4 = scmp.lt.s32.totalorder (!%p208_p3), %s1561_s18, 1  ;;  %s1571_s30 = smov (!%p208_p3), 127  }
   0x7   : > { %211 = sbr.rel (%p208_p3) target bundleno = 644 (0x284), region = 40  ;;  %s1572_s6 = smov (!%p208_p3), 2  }
   0x8   : > { %s1573_s7 = smov (!%p208_p3), 16   ;;  %s1574_s8 = smov (!%p208_p3), 126  }
   0x9   : > { %s1575_s9 = smov (!%p208_p3), 32   ;;  %s1576_s10 = smov (!%p208_p3), 18  }
   0xa   : > { %s1577_s11 = smov (!%p208_p3), 112   ;;  %s1578_s12 = smov (!%p208_p3), 111  }
   0xb   : > { %s1579_s13 = smov (!%p208_p3), 34   ;;  %s1580_s26 = smov (!%p208_p3), 110  }
   0xc   : > { %v264_v0 = vld [vmem:[%s1869_s3] sm:$0x3]  ;;  %s1877_s18 = smov (!%p243_p4, %s1561_s18), 1  ;;  %vm281_vm0 = vcmask 1043456   ;;  %vm465_vm1 = vcmask 15360   ;;  %vm576_vm2 = vcmask 130048  }
   0xd   : > { %266 = vst [vmem:[#allocation1] ss:$9 sm:$0xff] %v264_v0  ;;  %s1505_s24 = smul.u32 6, %s1877_s18  ;;  %v443_v17 = vld [vmem:[%s1870_s4] sm:$0x3]  ;;  %vm327_vm3 = vcmask 1039360  }
   0xe   : > { %vm337_vm4 = vcmask 1041408   ;;  %vm330_vm5 = vcmask 31744   ;;  %vm778_vm6 = vcmask 146432   ;;  %vm509_vm7 = vcmask 1031168   ;;  %s1583_s14 = smov 94  }
   0xf   : > { %s1642_s27 = scalar_lea.vmem %s1866_s0, %s1505_s24  ;;  %vm620_vm8 = vcmask 916480   ;;  %vm889_vm9 = vcmask 261120   ;;  %vm711_vm10 = vcmask 908288   ;;  %vm1091_vm11 = vcmask 277504   ;;  %s1484_s24 = sshll.u32 %s1877_s18, 6 }
  0x10   : > { %v263_v5 = vld [vmem:[%s1642_s27] sm:$0xf]  ;;  %vm822_vm12 = vcmask 900096   ;;  %vm933_vm13 = vcmask 785408   ;;  %vm1024_vm14 = vcmask 777216   ;;  %vm1135_vm15 = vcmask 769024   ;;  %s1837_s28 = scalar_lea.vmem %s1871_s5, %s1484_s24 }
  0x11   : > { %v275_v10 = vunpack.c.l.bf16 %v263_v5  ;;  %v297_v14 = vld [vmem:[%s1642_s27] sm:$0x3f] }
  0x12   : > { %v442_v31 = vld [vmem:[%s1642_s27] sm:$0x3f] }
  0x13   : > { %v455_v32 = vunpack.c.h.bf16 %v442_v31  ;;  %v454_v33 = vunpack.c.l.bf16 %v442_v31  ;;  %v570_v39 = vld [vmem:[%s1642_s27] sm:$0x3f] }
  0x14   : > { %v267_v1 = vld [vmem:[#allocation1] sm:$0xff]  ;;  %v268_v2 = vld [vmem:[#allocation1 + $0x9] sm:$0xff]  ;;  %v572_v40 = vunpack.c.h.bf16 %v570_v39  ;;  %v571_v41 = vunpack.c.l.bf16 %v570_v39 }
  0x15   : > { %v269_v3 = vpack.i.b16 %v267_v1, %v267_v1  ;;  %v272_v4 = vpack.i.b16 %v268_v2, %v268_v2  ;;  %v681_v53 = vld [vmem:[%s1642_s27] sm:$0x3f] }
  0x17   : > { %v271_v6 = vperm.slane %v269_v3, 0  ;;  %v274_v7 = vperm.slane %v272_v4, 0 }
  0x19   : > { %v276_v8 = vunpack.c.l.bf16 %v271_v6  ;;  %v277_v9 = vunpack.c.l.bf16 %v274_v7  ;;  %v1488_v6 = vld [vmem:[%s1867_s1 + $0x18] sm:$0xff]  ;;  %v1487_v7 = vld [vmem:[%s1867_s1 + $0x10] sm:$0xff] }
  0x1b   : > { %v280_v11 = vrot.slane %v277_v9, 4 }
  0x1d   : > { %v1646_v12 = vsel %vm281_vm0, %v276_v8, %v280_v11 }
  0x1e   : > { %v284_v13 = vmul.f32 %v1646_v12, %v275_v10 }
  0x20   : > { %286 = vst [vmem:[#allocation1] ss:$2 sm:$0xff] %v284_v13 }
  0x27   : > { %v1650_v15 = vld.sshfl [vmem:[#allocation1] sm:$0xff pattern:$0x75316420]  ;;  %v1652_v16 = vld.sshfl [vmem:[#allocation1 + $0x8] sm:$0xff pattern:$0x75316420] }
  0x28   : > { %314 = vst [vmem:[#allocation1] ss:$4 sm:$0xff] %v297_v14  ;;  %v291_v8 = vpack.c.bf16 %v1650_v15, %v1650_v15  ;;  %v292_v9 = vpack.c.bf16 %v1652_v16, %v1652_v16  ;;  %v772_v14 = vld [vmem:[%s1642_s27] sm:$0x3f] }
  0x29   : > { %v774_v15 = vunpack.c.h.bf16 %v772_v14 }
  0x2a   : > { %v399_v10 = vsel %vm337_vm4, %v291_v8, 0  ;;  %v402_v11 = vsel %vm337_vm4, %v292_v9, 0  ;;  %v1492_v8 = vld [vmem:[%s1867_s1 + $0x38] sm:$0xff] }
  0x2f   : > { %v315_v18 = vld.sshfl [vmem:[#allocation1] sm:$0xff pattern:$0x73625140]  ;;  %v317_v19 = vld.sshfl [vmem:[#allocation1 + $0x8] sm:$0xff pattern:$0x73625140] }
  0x30   : > { %v319_v20 = vld.sshfl [vmem:[#allocation1 + $0x10] sm:$0xff pattern:$0x73625140]  ;;  %321 = vrot.lane.b32.xlu1 %v315_v18, %s1571_s30 }
  0x31   : > { %445 = vst [vmem:[#allocation1] ss:$9 sm:$0xff] %v443_v17  ;;  %325 = vrot.lane.b32.xlu2 %v319_v20, %s1571_s30  ;;  %v773_v17 = vunpack.c.l.bf16 %v772_v14 }
  0x38   : > { %v446_v21 = vld [vmem:[#allocation1] sm:$0xff]  ;;  %v447_v22 = vld [vmem:[#allocation1 + $0x9] sm:$0xff]  ;;  %323 = vrot.lane.b32.xlu1 %v317_v19, %s1571_s30 }
  0x39   : > { %v448_v23 = vpack.i.b16 %v446_v21, %v446_v21  ;;  %v451_v24 = vpack.i.b16 %v447_v22, %v447_v22  ;;  %v1486_v19 = vld [vmem:[%s1867_s1 + $0x8] sm:$0xff] }
  0x3b   : > { %v450_v25 = vperm.slane %v448_v23, 0  ;;  %v453_v26 = vperm.slane %v451_v24, 0 }
  0x3d   : > { %v456_v27 = vunpack.c.l.bf16 %v450_v25  ;;  %v457_v28 = vunpack.c.l.bf16 %v453_v26 }
  0x3f   : > { %v460_v29 = vrot.slane %v457_v28, 4 }
  0x41   : > { %v461_v30 = vsel %vm281_vm0, %v456_v27, %v460_v29 }
  0x42   : > { %462 = vrot.lane.b32.xlu0 %v461_v30, %s1572_s6 }
  0x4a   : > { %573 = vrot.lane.b32.xlu0 %v1646_v12, %s1573_s7 }
  0x8b   : > { %v326_v1 = vpop.permute.xlu2 %325 }
  0xa2   : > { %v322_v63 = vpop.permute.xlu1 %321 }
  0xaa   : > { %v324_v0 = vpop.permute.xlu1 %323 }
  0xab   : > { %v329_v2 = vsel %vm327_vm3, %v324_v0, %v326_v1  ;;  %v328_v3 = vsel %vm327_vm3, %v322_v63, %v324_v0 }
  0xac   : > { %v342_v4 = vsel %vm337_vm4, %v329_v2, 0  ;;  %v339_v5 = vsel %vm337_vm4, %v328_v3, 0 }
  0xad   : > { %370 = vmatpush.bf16.msra.mxu1 %v342_v4  ;;  %1504 = vmatpush.bf16.msra.mxu3 %v342_v4 }
  0xae   : > { %351 = vmatpush.bf16.msra.mxu0 %v339_v5  ;;  %1503 = vmatpush.bf16.msra.mxu2 %v339_v5 }
  0xb0   : > { %1357 = vmatmul.msk.bf16.vlgmr.msra.gmra.mxu3 %vm330_vm5, %v1488_v6  ;;  %1356 = vmatmul.msk.bf16.vlgmr.msra.gmra.mxu1 %vm330_vm5, %v1487_v7 }
  0xb1   : > { %1355 = vmatmul.msk.bf16.vlgmr.msra.gmra.mxu2 %vm330_vm5, %v1488_v6  ;;  %1354 = vmatmul.msk.bf16.vlgmr.msra.gmra.mxu0 %vm330_vm5, %v1487_v7 }
  0xb2   : > { %411 = vmatpush.bf16.msrb.mxu2 %v399_v10  ;;  %430 = vmatpush.bf16.msrb.mxu3 %v402_v11 }
  0xb4   : > { %v463_v34 = vpop.permute.xlu0 %462 }
  0xb5   : > { %v464_v35 = vrot.slane %v463_v34, 4 }
  0xb7   : > { %v466_v36 = vsel %vm465_vm1, %v464_v35, %v463_v34  ;;  %v470_v37 = vmul.f32 %v464_v35, %v455_v32  ;;  %v1489_v35 = vld [vmem:[%s1867_s1 + $0x20] sm:$0xff] }
  0xb8   : > { %v469_v38 = vmul.f32 %v466_v36, %v454_v33  ;;  %v883_v36 = vld [vmem:[%s1642_s27] sm:$0x3f] }
  0xb9   : > { %475 = vst [vmem:[#allocation1 + $0x10] ss:$2 sm:$0xff] %v470_v37  ;;  %v884_v39 = vunpack.c.l.bf16 %v883_v36 }
  0xba   : > { %473 = vst [vmem:[#allocation1] ss:$2 sm:$0xff] %v469_v38  ;;  %v885_v38 = vunpack.c.h.bf16 %v883_v36 }
  0xbc   : > { %v574_v42 = vpop.permute.xlu0 %573 }
  0xbd   : > { %v575_v43 = vrot.slane %v574_v42, 4 }
  0xbf   : > { %v577_v44 = vsel %vm576_vm2, %v575_v43, %v574_v42  ;;  %v581_v45 = vmul.f32 %v575_v43, %v572_v40 }
  0xc0   : > { %v580_v46 = vmul.f32 %v577_v44, %v571_v41  ;;  %v478_v47 = vld.sshfl [vmem:[#allocation1 + $0x10] sm:$0xff pattern:$0x75316420] }
  0xc1   : > { %v484_v48 = vpack.c.bf16 %v478_v47, %v478_v47  ;;  %586 = vst [vmem:[#allocation1 + $0x10] ss:$2 sm:$0xff] %v581_v45  ;;  %v477_v49 = vld.sshfl [vmem:[#allocation1 + $0x8] sm:$0xff pattern:$0x75316420]  ;;  %v1491_v47 = vld [vmem:[%s1867_s1 + $0x30] sm:$0xff] }
  0xc2   : > { %v483_v50 = vpack.c.bf16 %v477_v49, %v477_v49  ;;  %v476_v51 = vld.sshfl [vmem:[#allocation1] sm:$0xff pattern:$0x75316420] }
  0xc3   : > { %507 = vrot.lane.b32.xlu1 %v484_v48, %s1574_s8  ;;  %v482_v52 = vpack.c.bf16 %v476_v51, %v476_v51  ;;  %584 = vst [vmem:[#allocation1] ss:$2 sm:$0xff] %v580_v46 }
  0xc4   : > { %505 = vrot.lane.b32.xlu0 %v483_v50, %s1574_s8 }
  0xc5   : > { %503 = vrot.lane.b32.xlu2 %v482_v52, %s1574_s8 }
  0xc8   : > { %v589_v54 = vld.sshfl [vmem:[#allocation1 + $0x10] sm:$0xff pattern:$0x75316420] }
  0xc9   : > { %v595_v58 = vpack.c.bf16 %v589_v54, %v589_v54 }
  0xca   : > { %v587_v55 = vld.sshfl [vmem:[#allocation1] sm:$0xff pattern:$0x75316420]  ;;  %v588_v56 = vld.sshfl [vmem:[#allocation1 + $0x8] sm:$0xff pattern:$0x75316420] }
  0xcb   : > { %v593_v57 = vpack.c.bf16 %v587_v55, %v587_v55  ;;  %698 = vst [vmem:[#allocation1] ss:$4 sm:$0xff] %v681_v53  ;;  %v594_v59 = vpack.c.bf16 %v588_v56, %v588_v56  ;;  %v1490_v55 = vld [vmem:[%s1867_s1 + $0x28] sm:$0xff]  ;;  %v994_v56 = vld [vmem:[%s1642_s27] sm:$0x3f] }
  0xcc   : > { %886 = vrot.lane.b32.xlu0 %v1646_v12, %s1575_s9  ;;  %v1485_v12 = vld [vmem:[%s1867_s1] sm:$0xff]  ;;  %s1581_s9 = smov 96  }
  0xcd   : > { %775 = vrot.lane.b32.xlu2 %v461_v30, %s1576_s10  ;;  %614 = vrot.lane.b32.xlu1 %v593_v57, %s1577_s11 }
  0xce   : > { %1368 = vmatmul.msk.bf16.vlgmr.msrb.gmra.mxu3 %vm330_vm5, %v1485_v12  ;;  %1366 = vmatmul.msk.bf16.vlgmr.msrb.gmra.mxu2 %vm330_vm5, %v1485_v12 }
  0xd2   : > { %v699_v60 = vld.sshfl [vmem:[#allocation1] sm:$0xff pattern:$0x73625140]  ;;  %v703_v61 = vld.sshfl [vmem:[#allocation1 + $0x10] sm:$0xff pattern:$0x73625140] }
  0xd3   : > { %v701_v62 = vld.sshfl [vmem:[#allocation1 + $0x8] sm:$0xff pattern:$0x73625140] }
  0xd4   : > { %618 = vrot.lane.b32.xlu0 %v595_v58, %s1577_s11 }
  0xd5   : > { %616 = vrot.lane.b32.xlu2 %v594_v59, %s1577_s11  ;;  %705 = vrot.lane.b32.xlu1 %v699_v60, %s1578_s12  ;;  %s1582_s11 = smov 95  }
  0xdc   : > { %709 = vrot.lane.b32.xlu0 %v703_v61, %s1578_s12 }
  0xdd   : > { %707 = vrot.lane.b32.xlu2 %v701_v62, %s1578_s12  ;;  %1088 = vrot.lane.b32.xlu1 %v461_v30, %s1579_s13  ;;  %v1085_v62 = vld [vmem:[%s1642_s27] sm:$0x3f] }
  0xde   : > { %1369 = vmatmul.msk.bf16.gmra.mxu3 %vm330_vm5, %v1486_v19  ;;  %1367 = vmatmul.msk.bf16.gmra.mxu2 %vm330_vm5, %v1486_v19  ;;  %v1087_v1 = vunpack.c.h.bf16 %v1085_v62  ;;  %v1086_v3 = vunpack.c.l.bf16 %v1085_v62  ;;  %v1497_v62 = vld [vmem:[%s1867_s1 + $0x60] sm:$0xff] }
 0x11f   : > { %v504_v13 = vpop.permute.xlu2 %503 }
 0x127   : > { %v776_v16 = vpop.permute.xlu2 %775 }
 0x128   : > { %v777_v18 = vrot.slane %v776_v16, 4 }
 0x12a   : > { %v779_v20 = vsel %vm778_vm6, %v777_v18, %v776_v16  ;;  %v783_v21 = vmul.f32 %v777_v18, %v774_v15  ;;  %v1493_v15 = vld [vmem:[%s1867_s1 + $0x40] sm:$0xff] }
 0x12b   : > { %v782_v22 = vmul.f32 %v779_v20, %v773_v17 }
 0x12c   : > { %788 = vst [vmem:[#allocation1 + $0x10] ss:$2 sm:$0xff] %v783_v21 }
 0x12d   : > { %786 = vst [vmem:[#allocation1] ss:$2 sm:$0xff] %v782_v22  ;;  %v1494_v22 = vld [vmem:[%s1867_s1 + $0x48] sm:$0xff] }
 0x12f   : > { %v617_v37 = vpop.permute.xlu2 %616 }
 0x133   : > { %v791_v23 = vld.sshfl [vmem:[#allocation1 + $0x10] sm:$0xff pattern:$0x75316420] }
 0x134   : > { %v790_v24 = vld.sshfl [vmem:[#allocation1 + $0x8] sm:$0xff pattern:$0x75316420]  ;;  %v797_v25 = vpack.c.bf16 %v791_v23, %v791_v23  ;;  %v789_v26 = vld.sshfl [vmem:[#allocation1] sm:$0xff pattern:$0x75316420]  ;;  %v358_v23 = vpop.f32.mrf.mxu2 }
 0x135   : > { %v508_v27 = vpop.permute.xlu1 %507  ;;  %v796_v28 = vpack.c.bf16 %v790_v24, %v790_v24  ;;  %v795_v29 = vpack.c.bf16 %v789_v26, %v789_v26  ;;  %v377_v24 = vpop.f32.mrf.mxu3 }
 0x136   : > { %820 = vrot.lane.b32.xlu1 %v797_v25, %s1580_s26  ;;  %v506_v30 = vpop.permute.xlu0 %505 }
 0x137   : > { %818 = vrot.lane.b32.xlu0 %v796_v28, %s1580_s26  ;;  %v510_v31 = vsel %vm509_vm7, %v504_v13, %v506_v30  ;;  %v511_v32 = vsel %vm509_vm7, %v506_v30, %v508_v27  ;;  %816 = vrot.lane.b32.xlu2 %v795_v29, %s1580_s26  ;;  %v708_v50 = vpop.permute.xlu2 %707  ;;  %v353_v27 = vpop.f32.mrf.mxu0 }
 0x138   : > { %v519_v33 = vsel %vm337_vm4, %v510_v31, 0  ;;  %v522_v34 = vsel %vm337_vm4, %v511_v32, 0  ;;  %v372_v28 = vpop.f32.mrf.mxu1 }
 0x139   : > { %531 = vmatpush.bf16.msrb.mxu0 %v519_v33  ;;  %550 = vmatpush.bf16.msrb.mxu1 %v522_v34 }
 0x13c   : > { %1382 = vmatmul.msk.bf16.vlgmr.msrb.gmra.mxu0 %vm330_vm5, %v1489_v35  ;;  %1384 = vmatmul.msk.bf16.vlgmr.msrb.gmra.mxu1 %vm330_vm5, %v1489_v35  ;;  %v360_v25 = vpop.f32.mrf.mxu2 }
 0x13d   : > { %v379_v26 = vpop.f32.mrf.mxu3 }
 0x13e   : > { %v887_v40 = vpop.permute.xlu0 %886 }
 0x13f   : > { %v615_v41 = vpop.permute.xlu1 %614  ;;  %v888_v42 = vrot.slane %v887_v40, 4 }
 0x140   : > { %v621_v43 = vsel %vm620_vm8, %v615_v41, %v617_v37 }
 0x141   : > { %v630_v44 = vsel %vm337_vm4, %v621_v43, 0  ;;  %v890_v45 = vsel %vm889_vm9, %v888_v42, %v887_v40  ;;  %v894_v46 = vmul.f32 %v888_v42, %v885_v38  ;;  %v1495_v38 = vld [vmem:[%s1867_s1 + $0x50] sm:$0xff]  ;;  %v374_v40 = vpop.f32.mrf.mxu1 }
 0x142   : > { %v893_v48 = vmul.f32 %v890_v45, %v884_v39  ;;  %642 = vmatpush.bf16.msra.mxu2 %v630_v44  ;;  %v355_v39 = vpop.f32.mrf.mxu0 }
 0x143   : > { %899 = vst [vmem:[#allocation1 + $0x10] ss:$2 sm:$0xff] %v894_v46 }
 0x144   : > { %897 = vst [vmem:[#allocation1] ss:$2 sm:$0xff] %v893_v48  ;;  %v1496_v48 = vld [vmem:[%s1867_s1 + $0x58] sm:$0xff] }
 0x145   : > { %1398 = vmatmul.msk.bf16.vlgmr.msra.gmra.mxu2 %vm330_vm5, %v1491_v47 }
 0x146   : > { %v619_v49 = vpop.permute.xlu0 %618 }
 0x147   : > { %v706_v51 = vpop.permute.xlu1 %705  ;;  %v622_v52 = vsel %vm620_vm8, %v617_v37, %v619_v49 }
 0x148   : > { %v712_v53 = vsel %vm711_vm10, %v706_v51, %v708_v50  ;;  %v633_v54 = vsel %vm337_vm4, %v622_v52, 0 }
 0x149   : > { %v721_v57 = vsel %vm337_vm4, %v712_v53, 0  ;;  %661 = vmatpush.bf16.msra.mxu3 %v633_v54 }
 0x14a   : > { %733 = vmatpush.bf16.msra.mxu0 %v721_v57  ;;  %v902_v58 = vld.sshfl [vmem:[#allocation1 + $0x10] sm:$0xff pattern:$0x75316420] }
 0x14b   : > { %v908_v59 = vpack.c.bf16 %v902_v58, %v902_v58  ;;  %v901_v60 = vld.sshfl [vmem:[#allocation1 + $0x8] sm:$0xff pattern:$0x75316420]  ;;  %v900_v61 = vld.sshfl [vmem:[#allocation1] sm:$0xff pattern:$0x75316420] }
 0x14c   : > { %v907_v63 = vpack.c.bf16 %v901_v60, %v901_v60  ;;  %v906_v0 = vpack.c.bf16 %v900_v61, %v900_v61  ;;  %1011 = vst [vmem:[#allocation1] ss:$4 sm:$0xff] %v994_v56  ;;  %1383 = vmatmul.msk.bf16.gmra.mxu0 %vm330_vm5, %v1490_v55  ;;  %1385 = vmatmul.msk.bf16.gmra.mxu1 %vm330_vm5, %v1490_v55 }
 0x14d   : > { %931 = vrot.lane.b32.xlu1 %v908_v59, %s1581_s9  ;;  %1400 = vmatmul.msk.bf16.vlgmr.msra.gmra.mxu3 %vm330_vm5, %v1491_v47 }
 0x14e   : > { %929 = vrot.lane.b32.xlu0 %v907_v63, %s1581_s9  ;;  %927 = vrot.lane.b32.xlu2 %v906_v0, %s1581_s9  ;;  %v710_v2 = vpop.permute.xlu0 %709 }
 0x14f   : > { %v1089_v4 = vpop.permute.xlu1 %1088  ;;  %v713_v5 = vsel %vm711_vm10, %v708_v50, %v710_v2 }
 0x150   : > { %v1090_v6 = vrot.slane %v1089_v4, 4  ;;  %v724_v7 = vsel %vm337_vm4, %v713_v5, 0 }
 0x151   : > { %752 = vmatpush.bf16.msra.mxu1 %v724_v7  ;;  %v413_v29 = vpop.f32.mrf.mxu2  ;;  %v432_v31 = vpop.f32.mrf.mxu3 }
 0x152   : > { %v1092_v9 = vsel %vm1091_vm11, %v1090_v6, %v1089_v4  ;;  %v1096_v10 = vmul.f32 %v1090_v6, %v1087_v1  ;;  %v414_v43 = vadd.f32 %v413_v29, %v353_v27  ;;  %v433_v44 = vadd.f32 %v432_v31, %v372_v28 }
 0x153   : > { %v1095_v11 = vmul.f32 %v1092_v9, %v1086_v3  ;;  %v1016_v12 = vld.sshfl [vmem:[#allocation1 + $0x10] sm:$0xff pattern:$0x73625140]  ;;  %v1014_v13 = vld.sshfl [vmem:[#allocation1 + $0x8] sm:$0xff pattern:$0x73625140] }
 0x154   : > { %1101 = vst [vmem:[#allocation1 + $0x10] ss:$2 sm:$0xff] %v1096_v10  ;;  %v1012_v14 = vld.sshfl [vmem:[#allocation1] sm:$0xff pattern:$0x73625140] }
 0x155   : > { %1022 = vrot.lane.b32.xlu1 %v1016_v12, %s1582_s11  ;;  %1099 = vst [vmem:[#allocation1] ss:$2 sm:$0xff] %v1095_v11  ;;  %1399 = vmatmul.msk.bf16.gmra.mxu2 %vm330_vm5, %v1492_v8 }
 0x156   : > { %1020 = vrot.lane.b32.xlu0 %v1014_v13, %s1582_s11  ;;  %1018 = vrot.lane.b32.xlu2 %v1012_v14, %s1582_s11 }
 0x159   : > { %v415_v41 = vpop.f32.mrf.mxu2  ;;  %v434_v42 = vpop.f32.mrf.mxu3 }
 0x15a   : > { %v416_v54 = vadd.f32 %v415_v41, %v355_v39  ;;  %v435_v55 = vadd.f32 %v434_v42, %v374_v40  ;;  %v1502_v39 = vld [vmem:[%s1867_s1 + $0x88] sm:$0xff] }
 0x15b   : > { %v1104_v17 = vld.sshfl [vmem:[#allocation1 + $0x10] sm:$0xff pattern:$0x75316420] }
 0x15c   : > { %v1103_v16 = vld.sshfl [vmem:[#allocation1 + $0x8] sm:$0xff pattern:$0x75316420]  ;;  %v1110_v18 = vpack.c.bf16 %v1104_v17, %v1104_v17  ;;  %v1102_v19 = vld.sshfl [vmem:[#allocation1] sm:$0xff pattern:$0x75316420]  ;;  %1414 = vmatmul.msk.bf16.vlgmr.msra.gmra.mxu0 %vm330_vm5, %v1493_v15  ;;  %1416 = vmatmul.msk.bf16.vlgmr.msra.gmra.mxu1 %vm330_vm5, %v1493_v15 }
 0x15d   : > { %v1109_v20 = vpack.c.bf16 %v1103_v16, %v1103_v16  ;;  %v1108_v21 = vpack.c.bf16 %v1102_v19, %v1102_v19  ;;  %1401 = vmatmul.msk.bf16.gmra.mxu3 %vm330_vm5, %v1492_v8 }
 0x15e   : > { %1133 = vrot.lane.b32.xlu1 %v1110_v18, %s1583_s14  ;;  %v1499_v18 = vld [vmem:[%s1867_s1 + $0x70] sm:$0xff] }
 0x15f   : > { %1131 = vrot.lane.b32.xlu0 %v1109_v20, %s1583_s14  ;;  %1129 = vrot.lane.b32.xlu2 %v1108_v21, %s1583_s14 }
 0x161   : > { %v418_v50 = vpop.f32.mrf.mxu2  ;;  %v437_v51 = vpop.f32.mrf.mxu3 }
 0x162   : > { %v419_v3 = vadd.f32 %v418_v50, %v358_v23  ;;  %v438_v4 = vadd.f32 %v437_v51, %v377_v24 }
 0x169   : > { %v420_v2 = vpop.f32.mrf.mxu2  ;;  %v439_v6 = vpop.f32.mrf.mxu3 }
 0x16a   : > { %v421_v5 = vadd.f32 %v420_v2, %v360_v25  ;;  %v440_v8 = vadd.f32 %v439_v6, %v379_v26  ;;  %v1498_v25 = vld [vmem:[%s1867_s1 + $0x68] sm:$0xff] }
 0x16c   : > { %1415 = vmatmul.msk.bf16.gmra.mxu0 %vm330_vm5, %v1494_v22  ;;  %1417 = vmatmul.msk.bf16.gmra.mxu1 %vm330_vm5, %v1494_v22 }
 0x191   : > { %v817_v32 = vpop.permute.xlu2 %816 }
 0x1a8   : > { %v821_v30 = vpop.permute.xlu1 %820  ;;  %v928_v52 = vpop.permute.xlu2 %927 }
 0x1a9   : > { %v819_v33 = vpop.permute.xlu0 %818 }
 0x1aa   : > { %v823_v34 = vsel %vm822_vm12, %v817_v32, %v819_v33  ;;  %v824_v35 = vsel %vm822_vm12, %v819_v33, %v821_v30  ;;  %v1197_v32 = vld [vmem:[%s1868_s2 + $0x8] sm:$0xff]  ;;  %v1198_v33 = vld [vmem:[%s1868_s2 + $0x10] sm:$0xff] }
 0x1ab   : > { %v832_v36 = vsel %vm337_vm4, %v823_v34, 0  ;;  %v835_v37 = vsel %vm337_vm4, %v824_v35, 0  ;;  %v1584_v34 = vmov 0   ;;  %v1196_v35 = vld [vmem:[%s1868_s2] sm:$0xff] }
 0x1ac   : > { %844 = vmatpush.bf16.msrb.mxu2 %v832_v36  ;;  %863 = vmatpush.bf16.msrb.mxu3 %v835_v37  ;;  %v1500_v36 = vld [vmem:[%s1867_s1 + $0x78] sm:$0xff] }
 0x1ad   : > { %1545 = vset.pattern.permute.xlu0 %v1584_v34  ;;  %1546 = vset.pattern.permute.xlu1 %v1584_v34  ;;  %v1199_v37 = vld [vmem:[%s1868_s2 + $0x18] sm:$0xff] }
 0x1ae   : > { %1207 = vperm.xlu0 %1545, %v1197_v32   ;;  %1212 = vperm.xlu1 %1546, %v1198_v33  }
 0x1af   : > { %1430 = vmatmul.msk.bf16.vlgmr.msrb.gmra.mxu2 %vm330_vm5, %v1495_v38  ;;  %1432 = vmatmul.msk.bf16.vlgmr.msrb.gmra.mxu3 %vm330_vm5, %v1495_v38  ;;  %v1501_v38 = vld [vmem:[%s1867_s1 + $0x80] sm:$0xff] }
 0x1b0   : > { %v1019_v9 = vpop.permute.xlu2 %1018  ;;  %1544 = vset.pattern.permute.xlu2 %v1584_v34 }
 0x1b1   : > { %1202 = vperm.xlu2 %1544, %v1196_v35  }
 0x1b9   : > { %v533_v45 = vpop.f32.mrf.mxu0  ;;  %v552_v47 = vpop.f32.mrf.mxu1  ;;  %1217 = vperm.xlu2 %1544, %v1199_v37  }
 0x1ba   : > { %v1742_v46 = vadd.f32 %v533_v45, %v414_v43  ;;  %v1747_v49 = vadd.f32 %v552_v47, %v433_v44  ;;  %v1130_v20 = vpop.permute.xlu2 %1129 }
 0x1bf   : > { %1431 = vmatmul.msk.bf16.gmra.mxu2 %vm330_vm5, %v1496_v48  ;;  %1433 = vmatmul.msk.bf16.gmra.mxu3 %vm330_vm5, %v1496_v48  ;;  %v932_v53 = vpop.permute.xlu1 %931 }
 0x1c0   : > { %v930_v56 = vpop.permute.xlu0 %929 }
 0x1c1   : > { %v934_v57 = vsel %vm933_vm13, %v928_v52, %v930_v56  ;;  %v935_v58 = vsel %vm933_vm13, %v930_v56, %v932_v53  ;;  %v535_v59 = vpop.f32.mrf.mxu0  ;;  %v554_v0 = vpop.f32.mrf.mxu1 }
 0x1c2   : > { %v943_v60 = vsel %vm337_vm4, %v934_v57, 0  ;;  %v946_v61 = vsel %vm337_vm4, %v935_v58, 0  ;;  %v1756_v63 = vadd.f32 %v535_v59, %v416_v54  ;;  %v1758_v1 = vadd.f32 %v554_v0, %v435_v55 }
 0x1c3   : > { %955 = vmatpush.bf16.msrb.mxu0 %v943_v60  ;;  %974 = vmatpush.bf16.msrb.mxu1 %v946_v61 }
 0x1c6   : > { %1446 = vmatmul.msk.bf16.vlgmr.msrb.gmra.mxu0 %vm330_vm5, %v1497_v62  ;;  %1448 = vmatmul.msk.bf16.vlgmr.msrb.gmra.mxu1 %vm330_vm5, %v1497_v62 }
 0x1c7   : > { %v1023_v7 = vpop.permute.xlu1 %1022 }
 0x1c8   : > { %v1021_v10 = vpop.permute.xlu0 %1020  ;;  %v644_v40 = vpop.f32.mrf.mxu2 }
 0x1c9   : > { %v1025_v11 = vsel %vm1024_vm14, %v1019_v9, %v1021_v10  ;;  %v1026_v12 = vsel %vm1024_vm14, %v1021_v10, %v1023_v7  ;;  %v538_v13 = vpop.f32.mrf.mxu0  ;;  %v557_v16 = vpop.f32.mrf.mxu1  ;;  %v673_v10 = vadd.f32 %v644_v40, %v1742_v46 }
 0x1ca   : > { %v1034_v14 = vsel %vm337_vm4, %v1025_v11, 0  ;;  %v1037_v15 = vsel %vm337_vm4, %v1026_v12, 0  ;;  %v1764_v17 = vadd.f32 %v538_v13, %v419_v3  ;;  %v1769_v19 = vadd.f32 %v557_v16, %v438_v4 }
 0x1cb   : > { %1046 = vmatpush.bf16.msra.mxu2 %v1034_v14  ;;  %1065 = vmatpush.bf16.msra.mxu3 %v1037_v15 }
 0x1cf   : > { %1462 = vmatmul.msk.bf16.vlgmr.msra.gmra.mxu2 %vm330_vm5, %v1499_v18  ;;  %1464 = vmatmul.msk.bf16.vlgmr.msra.gmra.mxu3 %vm330_vm5, %v1499_v18 }
 0x1d0   : > { %v1134_v21 = vpop.permute.xlu1 %1133  ;;  %v663_v41 = vpop.f32.mrf.mxu3 }
 0x1d1   : > { %v1132_v22 = vpop.permute.xlu0 %1131  ;;  %v540_v23 = vpop.f32.mrf.mxu0  ;;  %v674_v11 = vadd.f32 %v663_v41, %v1747_v49 }
 0x1d2   : > { %v1136_v24 = vsel %vm1135_vm15, %v1130_v20, %v1132_v22  ;;  %v1137_v26 = vsel %vm1135_vm15, %v1132_v22, %v1134_v21  ;;  %v1776_v27 = vadd.f32 %v540_v23, %v421_v5  ;;  %v559_v28 = vpop.f32.mrf.mxu1  ;;  %v646_v42 = vpop.f32.mrf.mxu2 }
 0x1d3   : > { %v1145_v29 = vsel %vm337_vm4, %v1136_v24, 0  ;;  %v1148_v30 = vsel %vm337_vm4, %v1137_v26, 0  ;;  %v1780_v31 = vadd.f32 %v559_v28, %v440_v8  ;;  %v675_v22 = vadd.f32 %v646_v42, %v1756_v63 }
 0x1d4   : > { %1157 = vmatpush.bf16.msra.mxu0 %v1145_v29  ;;  %1176 = vmatpush.bf16.msra.mxu1 %v1148_v30 }
 0x1d6   : > { %1447 = vmatmul.msk.bf16.gmra.mxu0 %vm330_vm5, %v1498_v25  ;;  %1449 = vmatmul.msk.bf16.gmra.mxu1 %vm330_vm5, %v1498_v25 }
 0x1d8   : > { %v665_v43 = vpop.f32.mrf.mxu3 }
 0x1d9   : > { %v735_v44 = vpop.f32.mrf.mxu0  ;;  %v676_v23 = vadd.f32 %v665_v43, %v1758_v1 }
 0x1da   : > { %v754_v45 = vpop.f32.mrf.mxu1  ;;  %v649_v47 = vpop.f32.mrf.mxu2  ;;  %v764_v16 = vadd.f32 %v735_v44, %v673_v10 }
 0x1db   : > { %v765_v18 = vadd.f32 %v754_v45, %v674_v11  ;;  %v677_v1 = vadd.f32 %v649_v47, %v1764_v17 }
 0x1df   : > { %1463 = vmatmul.msk.bf16.gmra.mxu2 %vm330_vm5, %v1500_v36  ;;  %1465 = vmatmul.msk.bf16.gmra.mxu3 %vm330_vm5, %v1500_v36 }
 0x1e0   : > { %v668_v48 = vpop.f32.mrf.mxu3 }
 0x1e1   : > { %v737_v50 = vpop.f32.mrf.mxu0  ;;  %v678_v40 = vadd.f32 %v668_v48, %v1769_v19 }
 0x1e2   : > { %v756_v51 = vpop.f32.mrf.mxu1  ;;  %v1811_v52 = vpop.f32.mrf.mxu2  ;;  %v766_v33 = vadd.f32 %v737_v50, %v675_v22 }
 0x1e3   : > { %v767_v34 = vadd.f32 %v756_v51, %v676_v23  ;;  %v679_v10 = vadd.f32 %v1811_v52, %v1776_v27 }
 0x1e6   : > { %1478 = vmatmul.msk.bf16.vlgmr.msra.gmra.mxu0 %vm330_vm5, %v1501_v38  ;;  %1480 = vmatmul.msk.bf16.vlgmr.msra.gmra.mxu1 %vm330_vm5, %v1501_v38 }
 0x1e8   : > { %v1813_v53 = vpop.f32.mrf.mxu3 }
 0x1e9   : > { %v740_v54 = vpop.f32.mrf.mxu0  ;;  %v680_v11 = vadd.f32 %v1813_v53, %v1780_v31 }
 0x1ea   : > { %v759_v55 = vpop.f32.mrf.mxu1  ;;  %v768_v47 = vadd.f32 %v740_v54, %v677_v1 }
 0x1eb   : > { %v769_v19 = vadd.f32 %v759_v55, %v678_v40 }
 0x1f1   : > { %v1815_v60 = vpop.f32.mrf.mxu0 }
 0x1f2   : > { %v1817_v61 = vpop.f32.mrf.mxu1 }
 0x1f3   : > { %v771_v22 = vadd.f32 %v1817_v61, %v680_v11 }
 0x1f6   : > { %1479 = vmatmul.msk.bf16.gmra.mxu0 %vm330_vm5, %v1502_v39  ;;  %1481 = vmatmul.msk.bf16.gmra.mxu1 %vm330_vm5, %v1502_v39 }
 0x20b   : > { %v1203_v46 = vpop.permute.xlu2 %1202 }
 0x220   : > { %v1208_v51 = vpop.permute.xlu0 %1207 }
 0x232   : > { %v846_v56 = vpop.f32.mrf.mxu2  ;;  %v865_v57 = vpop.f32.mrf.mxu3 }
 0x233   : > { %v875_v20 = vadd.f32 %v846_v56, %v764_v16  ;;  %v876_v21 = vadd.f32 %v865_v57, %v765_v18 }
 0x23a   : > { %v848_v58 = vpop.f32.mrf.mxu2  ;;  %v867_v59 = vpop.f32.mrf.mxu3 }
 0x23b   : > { %v877_v37 = vadd.f32 %v848_v58, %v766_v33  ;;  %v878_v38 = vadd.f32 %v867_v59, %v767_v34 }
 0x242   : > { %v851_v2 = vpop.f32.mrf.mxu2  ;;  %v870_v3 = vpop.f32.mrf.mxu3 }
 0x243   : > { %v957_v62 = vpop.f32.mrf.mxu0  ;;  %v976_v0 = vpop.f32.mrf.mxu1 }
 0x244   : > { %v986_v24 = vadd.f32 %v957_v62, %v875_v20  ;;  %v987_v25 = vadd.f32 %v976_v0, %v876_v21  ;;  %v879_v62 = vadd.f32 %v851_v2, %v768_v47  ;;  %v880_v0 = vadd.f32 %v870_v3, %v769_v19  ;;  %v1213_v20 = vpop.permute.xlu1 %1212 }
 0x245   : > { %v770_v3 = vadd.f32 %v1815_v60, %v679_v10 }
 0x24a   : > { %v1819_v6 = vpop.f32.mrf.mxu2  ;;  %v1821_v7 = vpop.f32.mrf.mxu3 }
 0x24b   : > { %v959_v4 = vpop.f32.mrf.mxu0  ;;  %v978_v5 = vpop.f32.mrf.mxu1  ;;  %v881_v31 = vadd.f32 %v1819_v6, %v770_v3  ;;  %v882_v53 = vadd.f32 %v1821_v7, %v771_v22 }
 0x24c   : > { %v988_v41 = vadd.f32 %v959_v4, %v877_v37  ;;  %v989_v42 = vadd.f32 %v978_v5, %v878_v38 }
 0x252   : > { %v1048_v12 = vpop.f32.mrf.mxu2  ;;  %v1067_v13 = vpop.f32.mrf.mxu3 }
 0x253   : > { %v962_v8 = vpop.f32.mrf.mxu0  ;;  %v981_v9 = vpop.f32.mrf.mxu1  ;;  %v1077_v26 = vadd.f32 %v1048_v12, %v986_v24  ;;  %v1078_v49 = vadd.f32 %v1067_v13, %v987_v25 }
 0x254   : > { %v990_v12 = vadd.f32 %v962_v8, %v879_v62  ;;  %v991_v13 = vadd.f32 %v981_v9, %v880_v0 }
 0x25a   : > { %v1050_v28 = vpop.f32.mrf.mxu2  ;;  %v1069_v29 = vpop.f32.mrf.mxu3 }
 0x25b   : > { %v1825_v14 = vpop.f32.mrf.mxu0  ;;  %v1827_v15 = vpop.f32.mrf.mxu1  ;;  %v1079_v45 = vadd.f32 %v1050_v28, %v988_v41  ;;  %v1080_v50 = vadd.f32 %v1069_v29, %v989_v42 }
 0x25c   : > { %v992_v25 = vadd.f32 %v1825_v14, %v881_v31 }
 0x262   : > { %v1053_v58 = vpop.f32.mrf.mxu2  ;;  %v1072_v59 = vpop.f32.mrf.mxu3 }
 0x263   : > { %v1159_v30 = vpop.f32.mrf.mxu0  ;;  %v1178_v32 = vpop.f32.mrf.mxu1  ;;  %v1081_v16 = vadd.f32 %v1053_v58, %v990_v12  ;;  %v1082_v18 = vadd.f32 %v1072_v59, %v991_v13 }
 0x264   : > { %v1188_v35 = vadd.f32 %v1159_v30, %v1077_v26  ;;  %v1189_v36 = vadd.f32 %v1178_v32, %v1078_v49  ;;  %v1218_v30 = vpop.permute.xlu2 %1217 }
 0x266   : > { %v1220_v39 = vadd.f32 %v1203_v46, %v1188_v35  ;;  %v1221_v63 = vadd.f32 %v1203_v46, %v1189_v36  ;;  %v993_v46 = vadd.f32 %v1827_v15, %v882_v53 }
 0x268   : > { %v1228_v43 = vmax.f32 %v1220_v39, 0.0  ;;  %v1229_v44 = vmax.f32 %v1221_v63, 0.0 }
 0x26a   : > { %1236 = vst [vmem:[%s1837_s28] sm:$0xff] %v1228_v43  ;;  %v1055_v23 = vpop.f32.mrf.mxu2  ;;  %v1074_v24 = vpop.f32.mrf.mxu3 }
 0x26b   : > { %1237 = vst [vmem:[%s1837_s28 + $0x8] sm:$0xff] %v1229_v44  ;;  %v1161_v56 = vpop.f32.mrf.mxu0  ;;  %v1180_v17 = vpop.f32.mrf.mxu1  ;;  %v1083_v61 = vadd.f32 %v1055_v23, %v992_v25  ;;  %v1084_v49 = vadd.f32 %v1074_v24, %v993_v46 }
 0x26c   : > { %v1190_v48 = vadd.f32 %v1161_v56, %v1079_v45  ;;  %v1191_v57 = vadd.f32 %v1180_v17, %v1080_v50 }
 0x26e   : > { %v1222_v4 = vadd.f32 %v1208_v51, %v1190_v48  ;;  %v1223_v5 = vadd.f32 %v1208_v51, %v1191_v57 }
 0x270   : > { %v1230_v54 = vmax.f32 %v1222_v4, 0.0  ;;  %v1231_v55 = vmax.f32 %v1223_v5, 0.0 }
 0x272   : > { %1238 = vst [vmem:[%s1837_s28 + $0x10] sm:$0xff] %v1230_v54 }
 0x273   : > { %1239 = vst [vmem:[%s1837_s28 + $0x18] sm:$0xff] %v1231_v55  ;;  %v1164_v21 = vpop.f32.mrf.mxu0  ;;  %v1183_v2 = vpop.f32.mrf.mxu1 }
 0x274   : > { %v1192_v27 = vadd.f32 %v1164_v21, %v1081_v16  ;;  %v1193_v52 = vadd.f32 %v1183_v2, %v1082_v18 }
 0x276   : > { %v1224_v8 = vadd.f32 %v1213_v20, %v1192_v27  ;;  %v1225_v9 = vadd.f32 %v1213_v20, %v1193_v52 }
 0x278   : > { %v1232_v60 = vmax.f32 %v1224_v8, 0.0  ;;  %v1233_v26 = vmax.f32 %v1225_v9, 0.0 }
 0x27a   : > { %1240 = vst [vmem:[%s1837_s28 + $0x20] sm:$0xff] %v1232_v60 }
 0x27b   : > { %1241 = vst [vmem:[%s1837_s28 + $0x28] sm:$0xff] %v1233_v26  ;;  %v1166_v28 = vpop.f32.mrf.mxu0  ;;  %v1185_v6 = vpop.f32.mrf.mxu1 }
 0x27c   : > { %v1194_v29 = vadd.f32 %v1166_v28, %v1083_v61  ;;  %v1195_v7 = vadd.f32 %v1185_v6, %v1084_v49 }
 0x27e   : > { %v1226_v32 = vadd.f32 %v1218_v30, %v1194_v29  ;;  %v1227_v33 = vadd.f32 %v1218_v30, %v1195_v7 }
 0x280   : > { %v1234_v34 = vmax.f32 %v1226_v32, 0.0  ;;  %v1235_v35 = vmax.f32 %v1227_v33, 0.0 }
 0x282   : > { %1242 = vst [vmem:[%s1837_s28 + $0x30] sm:$0xff] %v1234_v34 }
 0x283   : > { %1243 = vst [vmem:[%s1837_s28 + $0x38] sm:$0xff] %v1235_v35 }
 0x284 PF: > { %s15_s20 = sadd.s32 1, %s1569_s20   ;;  %s1872_s18 = smov %s1565_s19 }
 0x285   : > { %p12_p5 = scmp.ge.s32.totalorder %s15_s20, 4   ;;  %s1873_s19 = smov %s1875_s21 }
 0x287   :  { %14 = sbr.rel (!%p12_p5) target bundleno = 2 (0x2), region = 83 }

</bundles_post_ra>
